<compile_context>
chip_gen: v7x
topology: tpu7x:2x2x1
jax: 0.10.0
libtpu: 0.0.40
codegen_flags: <defaults>
</compile_context>

<pallas_src>
import math
import jax
import jax.numpy as jnp
from jax.experimental import pallas as pl
from jax.experimental.pallas import tpu as pltpu

LANE = 128          # vreg lane width
SUBLANE_PACK = 16   # bf16 packs (16, 128) per vreg


def _round_up(x, m):
    return (x + m - 1) // m * m


def _cdiv(a, b):
    return (a + b - 1) // b


def _pad_feature_dim(d, multiple):
    # Dims <= 128 stay at 128 (lane-dense, no over-padding); larger dims round
    # up to `multiple` (128 default; 256 is better on v6e/v7x when MXU-bound).
    if d <= LANE:
        return LANE
    return _round_up(d, max(multiple, LANE))


def _choose_batch_tiling(B, tile_b):
    """Returns (tile_rows, padded_batch). Tiles are multiples of 16 rows,
    padding is spread across blocks, and we aim for >=2 blocks (v7x megacore)
    whenever the batch is big enough for two 16-row blocks."""
    b_min = _round_up(B, SUBLANE_PACK)
    if b_min <= SUBLANE_PACK:
        return b_min, b_min                      # single tiny block
    if b_min <= tile_b:
        n_blocks = 2                             # feed both v7x TensorCores
    else:
        n_blocks = _cdiv(b_min, tile_b)          # spread padding across blocks
    tile = _round_up(_cdiv(b_min, n_blocks), SUBLANE_PACK)
    b_pad = tile * _cdiv(b_min, tile)
    return tile, b_pad


# ---------------------------------------------------------------------------
# Kernel
# ---------------------------------------------------------------------------
def dae_kernel(x_ref, w1_ref, b1_ref, w2_ref, b2_ref,
               w3_ref, b3_ref, w4_ref, b4_ref, o_ref):
    cdt = w1_ref.dtype  # bf16 compute dtype for MXU inputs
    x = x_ref[...]
    # encode
    h1 = jnp.maximum(
        jnp.dot(x, w1_ref[...], preferred_element_type=jnp.float32)
        + b1_ref[...], 0.0)
    z = jnp.maximum(
        jnp.dot(h1.astype(cdt), w2_ref[...], preferred_element_type=jnp.float32)
        + b2_ref[...], 0.0)
    # decode
    h2 = jnp.maximum(
        jnp.dot(z.astype(cdt), w3_ref[...], preferred_element_type=jnp.float32)
        + b3_ref[...], 0.0)
    logits = (jnp.dot(h2.astype(cdt), w4_ref[...],
                      preferred_element_type=jnp.float32) + b4_ref[...])
    # sigmoid(x) == 0.5 * (tanh(0.5 * x) + 1): single EUP op per element.
    y = 0.5 * (jnp.tanh(0.5 * logits) + 1.0)
    o_ref[...] = y.astype(o_ref.dtype)


# ---------------------------------------------------------------------------
# Parameter preparation (run once, outside the hot path)
# ---------------------------------------------------------------------------
def prepare_params(params, *, compute_dtype=jnp.bfloat16, feature_pad_multiple=LANE):
    """Pad all feature dims to lane-dense multiples and cast weights to the
    MXU compute dtype once, so the per-call forward does no weight traffic
    beyond the kernel's own DMAs."""
    input_dim, hidden_dim = params["w1"].shape
    output_dim = params["w2"].shape[1]

    ip = _pad_feature_dim(input_dim, feature_pad_multiple)
    hp = _pad_feature_dim(hidden_dim, feature_pad_multiple)
    op = _pad_feature_dim(output_dim, feature_pad_multiple)

    def pad_w(w, r, c):
        return jnp.pad(w, ((0, r - w.shape[0]), (0, c - w.shape[1]))
                       ).astype(compute_dtype)

    def pad_b(b, c):
        return jnp.pad(b, ((0, 0), (0, c - b.shape[1]))).astype(jnp.float32)

    return {
        "w1": pad_w(params["w1"], ip, hp), "b1": pad_b(params["b1"], hp),
        "w2": pad_w(params["w2"], hp, op), "b2": pad_b(params["b2"], op),
        "w3": pad_w(params["w3"], op, hp), "b3": pad_b(params["b3"], hp),
        "w4": pad_w(params["w4"], hp, ip), "b4": pad_b(params["b4"], ip),
        "dims": (int(input_dim), int(ip), int(hp), int(op)),
    }


# ---------------------------------------------------------------------------
# Forward wrapper
# ---------------------------------------------------------------------------
def dae_forward(x, prepared, *, tile_b=512, out_dtype=jnp.float32):
    """x: [B, input_dim] float32. prepared: output of prepare_params."""
    B, input_dim = x.shape
    in_dim, ip, hp, op = prepared["dims"]
    assert input_dim == in_dim, "input feature dim mismatch with prepared params"
    cdt = prepared["w1"].dtype
    itemsize = jnp.dtype(cdt).itemsize

    # --- adaptive batch tiling ---------------------------------------------
    tile, b_pad = _choose_batch_tiling(B, tile_b)
    grid = (b_pad // tile,)

    x_p = jnp.pad(x, ((0, b_pad - B), (0, ip - input_dim))).astype(cdt)

    # Grid-invariant weights/biases: DMA'd once, single-buffered.
    def full(shape):
        return pl.BlockSpec(shape, lambda *_: (0,) * len(shape),
                            pipeline_mode=pl.Buffered(1))

    in_specs = [
        pl.BlockSpec((tile, ip), lambda i: (i, 0)),   # x tile (double-buffered)
        full((ip, hp)), full((1, hp)),                # W1^T, b1
        full((hp, op)), full((1, op)),                # W2^T, b2
        full((op, hp)), full((1, hp)),                # W3^T, b3
        full((hp, ip)), full((1, ip)),                # W4^T, b4
    ]
    out_spec = pl.BlockSpec((tile, ip), lambda i: (i, 0))

    # --- VMEM budget: 1x weights/biases + 2x (x tile + out tile) + activations
    weight_bytes = (ip * hp + hp * op + op * hp + hp * ip) * itemsize
    bias_bytes = (hp + op + hp + ip) * 4
    io_bytes = 2 * tile * ip * itemsize * 2          # x + out, double-buffered
    act_bytes = 3 * tile * max(ip, hp, op) * 4       # h1 / z / h2 temporaries
    vmem_limit = int(weight_bytes + bias_bytes + io_bytes + act_bytes) + (8 << 20)
    vmem_limit = min(max(vmem_limit, 32 << 20), 100 << 20)

    # --- advisory cost estimate ---------------------------------------------
    flops = 2 * b_pad * (ip * hp + hp * op + op * hp + hp * ip)
    bytes_accessed = (x_p.size * itemsize
                      + weight_bytes + bias_bytes
                      + b_pad * ip * itemsize)       # bf16 output writeback
    cost = pl.CostEstimate(flops=flops,
                           transcendentals=b_pad * ip,   # one tanh per element
                           bytes_accessed=bytes_accessed)

    out_pad = pl.pallas_call(
        dae_kernel,
        out_shape=jax.ShapeDtypeStruct((b_pad, ip), cdt),   # bf16 writeback
        grid_spec=pltpu.PrefetchScalarGridSpec(
            num_scalar_prefetch=0,
            grid=grid,
            in_specs=in_specs,
            out_specs=out_spec,
        ),
        compiler_params=pltpu.CompilerParams(
            dimension_semantics=("parallel",),
            vmem_limit_bytes=vmem_limit),
        cost_estimate=cost,
    )(x_p, prepared["w1"], prepared["b1"], prepared["w2"], prepared["b2"],
      prepared["w3"], prepared["b3"], prepared["w4"], prepared["b4"])

    return out_pad[:B, :input_dim].astype(out_dtype)


# ---------------------------------------------------------------------------
# Init / reference
# ---------------------------------------------------------------------------
def init_params(key, input_dim, hidden_dim, output_dim):
    """PyTorch-style init: U(-1/sqrt(fan_in), 1/sqrt(fan_in)).
    Weights stored already transposed to [in_dim, out_dim]."""
    def layer(k, fan_in, fan_out):
        kw, kb = jax.random.split(k)
        bound = 1.0 / math.sqrt(fan_in)
        w_t = jax.random.uniform(kw, (fan_in, fan_out), jnp.float32, -bound, bound)
        b = jax.random.uniform(kb, (1, fan_out), jnp.float32, -bound, bound)
        return w_t, b

    k1, k2, k3, k4 = jax.random.split(key, 4)
    w1, b1 = layer(k1, input_dim, hidden_dim)
    w2, b2 = layer(k2, hidden_dim, output_dim)
    w3, b3 = layer(k3, output_dim, hidden_dim)
    w4, b4 = layer(k4, hidden_dim, input_dim)
    return {"w1": w1, "b1": b1, "w2": w2, "b2": b2,
            "w3": w3, "b3": b3, "w4": w4, "b4": b4}


def dae_reference(x, p):
    h1 = jnp.maximum(x @ p["w1"] + p["b1"], 0.0)
    z = jnp.maximum(h1 @ p["w2"] + p["b2"], 0.0)
    h2 = jnp.maximum(z @ p["w3"] + p["b3"], 0.0)
    return jax.nn.sigmoid(h2 @ p["w4"] + p["b4"])


if __name__ == "__main__":
    key = jax.random.PRNGKey(0)
    kx, kp = jax.random.split(key)

    B, input_dim, hidden_dim, output_dim = 16, 64, 32, 16
    x = jax.random.normal(kx, (B, input_dim), jnp.float32)
    params = init_params(kp, input_dim, hidden_dim, output_dim)

    prepared = prepare_params(params)               # pad/cast weights once
    fwd = jax.jit(lambda xx: dae_forward(xx, prepared))

    out = jax.block_until_ready(fwd(x))

    ref = dae_reference(x, params)                  # f32 reference
    assert out.shape == (B, input_dim)
    # bf16 MXU inputs / bf16 output writeback with f32 accumulation: allow a
    # small absolute error on sigmoid outputs in [0, 1].
    assert jnp.allclose(out, ref, atol=2e-2, rtol=0.0), "mismatch vs reference"

    print("KERNEL_OK")
</pallas_src>

<mosaic_0001>
module attributes {stable_mosaic.version = 11 : i64} {
  func.func @dae_kernel(%arg0: i32, %arg1: memref<16x128xbf16, #tpu.memory_space<vmem>>, %arg2: memref<128x128xbf16, #tpu.memory_space<vmem>>, %arg3: memref<1x128xf32, #tpu.memory_space<vmem>>, %arg4: memref<128x128xbf16, #tpu.memory_space<vmem>>, %arg5: memref<1x128xf32, #tpu.memory_space<vmem>>, %arg6: memref<128x128xbf16, #tpu.memory_space<vmem>>, %arg7: memref<1x128xf32, #tpu.memory_space<vmem>>, %arg8: memref<128x128xbf16, #tpu.memory_space<vmem>>, %arg9: memref<1x128xf32, #tpu.memory_space<vmem>>, %arg10: memref<16x128xbf16, #tpu.memory_space<vmem>>) attributes {dimension_semantics = [#tpu.dimension_semantics<parallel>], iteration_bounds = array<i64: 1>, scalar_prefetch = 0 : i64, scratch_operands = 0 : i64, tpu.core_type = #tpu.core_type<tc>, window_params = [{transform_indices = @transform_0, window_bounds = array<i64: 16, 128>}, {pipeline_mode = #tpu.pipeline_mode<synchronous>, transform_indices = @transform_1, window_bounds = array<i64: 128, 128>}, {pipeline_mode = #tpu.pipeline_mode<synchronous>, transform_indices = @transform_2, window_bounds = array<i64: 1, 128>}, {pipeline_mode = #tpu.pipeline_mode<synchronous>, transform_indices = @transform_3, window_bounds = array<i64: 128, 128>}, {pipeline_mode = #tpu.pipeline_mode<synchronous>, transform_indices = @transform_4, window_bounds = array<i64: 1, 128>}, {pipeline_mode = #tpu.pipeline_mode<synchronous>, transform_indices = @transform_5, window_bounds = array<i64: 128, 128>}, {pipeline_mode = #tpu.pipeline_mode<synchronous>, transform_indices = @transform_6, window_bounds = array<i64: 1, 128>}, {pipeline_mode = #tpu.pipeline_mode<synchronous>, transform_indices = @transform_7, window_bounds = array<i64: 128, 128>}, {pipeline_mode = #tpu.pipeline_mode<synchronous>, transform_indices = @transform_8, window_bounds = array<i64: 1, 128>}, {transform_indices = @transform_9, window_bounds = array<i64: 16, 128>}]} {
    %c0 = arith.constant 0 : index
    %c0_0 = arith.constant 0 : index
    %0 = vector.load %arg1[%c0, %c0_0] : memref<16x128xbf16, #tpu.memory_space<vmem>>, vector<16x128xbf16>
    %c0_1 = arith.constant 0 : index
    %c0_2 = arith.constant 0 : index
    %1 = vector.load %arg2[%c0_1, %c0_2] : memref<128x128xbf16, #tpu.memory_space<vmem>>, vector<128x128xbf16>
    %cst = arith.constant dense<0.000000e+00> : vector<16x128xf32>
    %2 = tpu.matmul %0, %1, %cst {dimension_numbers = #tpu.dot_dimension_numbers<[1], [0], [0], [1], [0, 0, 1, 1], [], []>} : vector<16x128xbf16>, vector<128x128xbf16>, vector<16x128xf32> -> vector<16x128xf32>
    %c0_3 = arith.constant 0 : index
    %c0_4 = arith.constant 0 : index
    %3 = vector.load %arg3[%c0_3, %c0_4] : memref<1x128xf32, #tpu.memory_space<vmem>>, vector<1x128xf32>
    %4 = vector.broadcast %3 : vector<1x128xf32> to vector<16x128xf32>
    %5 = arith.addf %2, %4 : vector<16x128xf32>
    %cst_5 = arith.constant 0.000000e+00 : f32
    %6 = vector.broadcast %cst_5 : f32 to vector<16x128xf32>
    %7 = arith.maximumf %5, %6 : vector<16x128xf32>
    %8 = arith.truncf %7 : vector<16x128xf32> to vector<16x128xbf16>
    %c0_6 = arith.constant 0 : index
    %c0_7 = arith.constant 0 : index
    %9 = vector.load %arg4[%c0_6, %c0_7] : memref<128x128xbf16, #tpu.memory_space<vmem>>, vector<128x128xbf16>
    %cst_8 = arith.constant dense<0.000000e+00> : vector<16x128xf32>
    %10 = tpu.matmul %8, %9, %cst_8 {dimension_numbers = #tpu.dot_dimension_numbers<[1], [0], [0], [1], [0, 0, 1, 1], [], []>} : vector<16x128xbf16>, vector<128x128xbf16>, vector<16x128xf32> -> vector<16x128xf32>
    %c0_9 = arith.constant 0 : index
    %c0_10 = arith.constant 0 : index
    %11 = vector.load %arg5[%c0_9, %c0_10] : memref<1x128xf32, #tpu.memory_space<vmem>>, vector<1x128xf32>
    %12 = vector.broadcast %11 : vector<1x128xf32> to vector<16x128xf32>
    %13 = arith.addf %10, %12 : vector<16x128xf32>
    %cst_11 = arith.constant 0.000000e+00 : f32
    %14 = vector.broadcast %cst_11 : f32 to vector<16x128xf32>
    %15 = arith.maximumf %13, %14 : vector<16x128xf32>
    %16 = arith.truncf %15 : vector<16x128xf32> to vector<16x128xbf16>
    %c0_12 = arith.constant 0 : index
    %c0_13 = arith.constant 0 : index
    %17 = vector.load %arg6[%c0_12, %c0_13] : memref<128x128xbf16, #tpu.memory_space<vmem>>, vector<128x128xbf16>
    %cst_14 = arith.constant dense<0.000000e+00> : vector<16x128xf32>
    %18 = tpu.matmul %16, %17, %cst_14 {dimension_numbers = #tpu.dot_dimension_numbers<[1], [0], [0], [1], [0, 0, 1, 1], [], []>} : vector<16x128xbf16>, vector<128x128xbf16>, vector<16x128xf32> -> vector<16x128xf32>
    %c0_15 = arith.constant 0 : index
    %c0_16 = arith.constant 0 : index
    %19 = vector.load %arg7[%c0_15, %c0_16] : memref<1x128xf32, #tpu.memory_space<vmem>>, vector<1x128xf32>
    %20 = vector.broadcast %19 : vector<1x128xf32> to vector<16x128xf32>
    %21 = arith.addf %18, %20 : vector<16x128xf32>
    %cst_17 = arith.constant 0.000000e+00 : f32
    %22 = vector.broadcast %cst_17 : f32 to vector<16x128xf32>
    %23 = arith.maximumf %21, %22 : vector<16x128xf32>
    %24 = arith.truncf %23 : vector<16x128xf32> to vector<16x128xbf16>
    %c0_18 = arith.constant 0 : index
    %c0_19 = arith.constant 0 : index
    %25 = vector.load %arg8[%c0_18, %c0_19] : memref<128x128xbf16, #tpu.memory_space<vmem>>, vector<128x128xbf16>
    %cst_20 = arith.constant dense<0.000000e+00> : vector<16x128xf32>
    %26 = tpu.matmul %24, %25, %cst_20 {dimension_numbers = #tpu.dot_dimension_numbers<[1], [0], [0], [1], [0, 0, 1, 1], [], []>} : vector<16x128xbf16>, vector<128x128xbf16>, vector<16x128xf32> -> vector<16x128xf32>
    %c0_21 = arith.constant 0 : index
    %c0_22 = arith.constant 0 : index
    %27 = vector.load %arg9[%c0_21, %c0_22] : memref<1x128xf32, #tpu.memory_space<vmem>>, vector<1x128xf32>
    %28 = vector.broadcast %27 : vector<1x128xf32> to vector<16x128xf32>
    %29 = arith.addf %26, %28 : vector<16x128xf32>
    %cst_23 = arith.constant 5.000000e-01 : f32
    %30 = vector.broadcast %cst_23 : f32 to vector<16x128xf32>
    %31 = arith.mulf %30, %29 : vector<16x128xf32>
    %32 = math.tanh %31 : vector<16x128xf32>
    %cst_24 = arith.constant 1.000000e+00 : f32
    %33 = vector.broadcast %cst_24 : f32 to vector<16x128xf32>
    %34 = arith.addf %32, %33 : vector<16x128xf32>
    %cst_25 = arith.constant 5.000000e-01 : f32
    %35 = vector.broadcast %cst_25 : f32 to vector<16x128xf32>
    %36 = arith.mulf %35, %34 : vector<16x128xf32>
    %37 = arith.truncf %36 : vector<16x128xf32> to vector<16x128xbf16>
    %c0_26 = arith.constant 0 : index
    %c0_27 = arith.constant 0 : index
    %38 = vector.load %arg10[%c0_26, %c0_27] : memref<16x128xbf16, #tpu.memory_space<vmem>>, vector<16x128xbf16>
    tpu.vector_store %arg10[%c0_26, %c0_27], %37 {strides = array<i32>} : memref<16x128xbf16, #tpu.memory_space<vmem>>, vector<16x128xbf16>,
    return
  }
  func.func @transform_0(%arg0: i32) -> (i32, i32) {
    %c0_i32 = arith.constant 0 : i32
    %c0_i32_0 = arith.constant 0 : i32
    return %arg0, %c0_i32 : i32, i32
  }
  func.func @transform_1(%arg0: i32) -> (i32, i32) {
    %c0_i32 = arith.constant 0 : i32
    %c0_i32_0 = arith.constant 0 : i32
    %c0_i32_1 = arith.constant 0 : i32
    return %c0_i32, %c0_i32_0 : i32, i32
  }
  func.func @transform_2(%arg0: i32) -> (i32, i32) {
    %c0_i32 = arith.constant 0 : i32
    %c0_i32_0 = arith.constant 0 : i32
    %c0_i32_1 = arith.constant 0 : i32
    return %c0_i32, %c0_i32_0 : i32, i32
  }
  func.func @transform_3(%arg0: i32) -> (i32, i32) {
    %c0_i32 = arith.constant 0 : i32
    %c0_i32_0 = arith.constant 0 : i32
    %c0_i32_1 = arith.constant 0 : i32
    return %c0_i32, %c0_i32_0 : i32, i32
  }
  func.func @transform_4(%arg0: i32) -> (i32, i32) {
    %c0_i32 = arith.constant 0 : i32
    %c0_i32_0 = arith.constant 0 : i32
    %c0_i32_1 = arith.constant 0 : i32
    return %c0_i32, %c0_i32_0 : i32, i32
  }
  func.func @transform_5(%arg0: i32) -> (i32, i32) {
    %c0_i32 = arith.constant 0 : i32
    %c0_i32_0 = arith.constant 0 : i32
    %c0_i32_1 = arith.constant 0 : i32
    return %c0_i32, %c0_i32_0 : i32, i32
  }
  func.func @transform_6(%arg0: i32) -> (i32, i32) {
    %c0_i32 = arith.constant 0 : i32
    %c0_i32_0 = arith.constant 0 : i32
    %c0_i32_1 = arith.constant 0 : i32
    return %c0_i32, %c0_i32_0 : i32, i32
  }
  func.func @transform_7(%arg0: i32) -> (i32, i32) {
    %c0_i32 = arith.constant 0 : i32
    %c0_i32_0 = arith.constant 0 : i32
    %c0_i32_1 = arith.constant 0 : i32
    return %c0_i32, %c0_i32_0 : i32, i32
  }
  func.func @transform_8(%arg0: i32) -> (i32, i32) {
    %c0_i32 = arith.constant 0 : i32
    %c0_i32_0 = arith.constant 0 : i32
    %c0_i32_1 = arith.constant 0 : i32
    return %c0_i32, %c0_i32_0 : i32, i32
  }
  func.func @transform_9(%arg0: i32) -> (i32, i32) {
    %c0_i32 = arith.constant 0 : i32
    %c0_i32_0 = arith.constant 0 : i32
    return %arg0, %c0_i32 : i32, i32
  }
}

</mosaic_0001>

<bundles_post_ra>
// kernel: _lambda_.1
= control target key start
LH: loop header
LB: loop body
LE: loop exit
PB: predicated region body
PF: predicated region fallthrough
CT: control target
= control target key end

     0   :  { %14 = vsyncpa [#allocation3], 0  ;;  %s1030_s0 = inlined_call_operand.vmem [shape: bf16[16,128], index: 0, kind: input, shape index: {}]   ;;  %s1031_s1 = inlined_call_operand.hbm [shape: bf16[128,128], index: 1, kind: input, shape index: {}]   ;;  %s1032_s2 = inlined_call_operand.vmem [shape: f32[1,128], index: 2, kind: input, shape index: {}]   ;;  %s1033_s3 = inlined_call_operand.hbm [shape: bf16[128,128], index: 3, kind: input, shape index: {}]   ;;  %s1034_s4 = inlined_call_operand.vmem [shape: f32[1,128], index: 4, kind: input, shape index: {}]   ;;  %s1035_s5 = inlined_call_operand.hbm [shape: bf16[128,128], index: 5, kind: input, shape index: {}]   ;;  %s1036_s6 = inlined_call_operand.vmem [shape: f32[1,128], index: 6, kind: input, shape index: {}]   ;;  %s1037_s7 = inlined_call_operand.vmem [shape: bf16[128,128], index: 7, kind: input, shape index: {}]   ;;  %s1038_s8 = inlined_call_operand.vmem [shape: f32[1,128], index: 8, kind: input, shape index: {}]   ;;  %s1039_s9 = inlined_call_operand.vmem [shape: bf16[16,128], index: 9, kind: output, shape index: {}]  }
   0x1   :  { %15 = vsyncpa [#allocation5], 0  ;;  %s839_s30 = smov [#allocation4]   ;;  %s840_s11 = smov [#allocation2]  }
   0x2   :  { %s37_s10 = sshll.u32 %s839_s30, 4  ;;  %s23_s12 = sshll.u32 %s840_s11, 4  ;;  %s38_s10 = int_to_ptr.vmem [resolvable:$true] %s37_s10  ;;  %s896_s12 = int_to_ptr.vmem [resolvable:$true] %s23_s12 }
   0x3   :  { %s769_s15 = scalar_lea.hbm %s1033_s3, 1024 }
   0x4   :  { %p770_p0 = scmp.ne.s32.totalorder %s1033_s3, %s769_s15  ;;  %p773_p1 = scmp.lt.u32.totalorder %s769_s15, %s1033_s3 }
   0x6   :  { %p775_p2 = pnand %p773_p1, %p770_p0 }
   0x8   :  { %778 = shalt.err (!%p775_p2)
}
   0x9   :  { %s779_s20 = scalar_lea.vmem %s38_s10, 1024  ;;  %p784_p4 = scmp.lt.s32.totalorder %s38_s10, %s38_s10 }
   0xa   :  { %p780_p3 = scmp.ne.s32.totalorder %s38_s10, %s779_s20  ;;  %p785_p5 = scmp.lt.s32.totalorder %s779_s20, %s779_s20 }
   0xc   :  { %p786_p6 = por %p785_p5, %p784_p4 }
   0xe   :  { %p787_p7 = pnand %p786_p6, %p780_p3 }
  0x10   :  { %790 = shalt.err (!%p787_p7)
}
  0x11   :  { %s841_s21 = smov 64   ;;  %s842_s22 = smov 4  }
  0x12   :  { %43 = dma.hbm_to_vmem [thread:$0]  %s1033_s3, 1024, %s38_s10, [#allocation5], %s841_s21, %s841_s21, %s842_s22  }
  0x13   :  { %s791_s27 = scalar_lea.hbm %s1031_s1, 1024 }
  0x14   :  { %p792_p8 = scmp.ne.s32.totalorder %s1031_s1, %s791_s27  ;;  %p795_p9 = scmp.lt.u32.totalorder %s791_s27, %s1031_s1 }
  0x16   :  { %p797_p10 = pnand %p795_p9, %p792_p8 }
  0x18   :  { %800 = shalt.err (!%p797_p10)
}
  0x19   :  { %s801_s13 = scalar_lea.vmem %s896_s12, 1024  ;;  %p806_p12 = scmp.lt.s32.totalorder %s896_s12, %s896_s12 }
  0x1a   :  { %p802_p11 = scmp.ne.s32.totalorder %s896_s12, %s801_s13  ;;  %p807_p13 = scmp.lt.s32.totalorder %s801_s13, %s801_s13 }
  0x1c   :  { %p808_p0 = por %p807_p13, %p806_p12 }
  0x1e   :  { %p809_p1 = pnand %p808_p0, %p802_p11 }
  0x20   :  { %812 = shalt.err (!%p809_p1)
}
  0x21   :  { %29 = dma.hbm_to_vmem [thread:$0]  %s1031_s1, 1024, %s896_s12, [#allocation3], %s841_s21, %s841_s21, %s842_s22  }
  0x22   :  { %s843_s14 = smov [#allocation6]   ;;  %s813_s18 = scalar_lea.hbm %s1035_s5, 1024 }
  0x23   :  { %s51_s15 = sshll.u32 %s843_s14, 4  ;;  %p814_p2 = scmp.ne.s32.totalorder %s1035_s5, %s813_s18  ;;  %s52_s15 = int_to_ptr.vmem [resolvable:$true] %s51_s15 }
  0x24   :  { %p817_p3 = scmp.lt.u32.totalorder %s813_s18, %s1035_s5 }
  0x26   :  { %p819_p4 = pnand %p817_p3, %p814_p2 }
  0x28   :  { %822 = shalt.err (!%p819_p4)
}
  0x29   :  { %s823_s25 = scalar_lea.vmem %s52_s15, 1024  ;;  %p828_p6 = scmp.lt.s32.totalorder %s52_s15, %s52_s15 }
  0x2a   :  { %p824_p5 = scmp.ne.s32.totalorder %s52_s15, %s823_s25  ;;  %p829_p7 = scmp.lt.s32.totalorder %s823_s25, %s823_s25 }
  0x2c   :  { %p830_p8 = por %p829_p7, %p828_p6 }
  0x2e   :  { %p831_p9 = pnand %p830_p8, %p824_p5 }
  0x30   :  { %834 = shalt.err (!%p831_p9)
}
  0x31   :  { %57 = dma.hbm_to_vmem [thread:$0]  %s1035_s5, 1024, %s52_s15, [#allocation5], %s841_s21, %s841_s21, %s842_s22  }
  0x32   :  { %835 = dma.done.wait [#allocation3], 1024  }
  0x33   :  { %836 = vsyncadd [#allocation3], 4294966272 }
  0x34   :  { %837 = dma.done.wait [#allocation5], 2048  }
  0x35   :  { %838 = vsyncadd [#allocation5], 4294965248  ;;  %v844_v0 = vmov 0.0   ;;  %vm845_vm0 = vmmov 0   ;;  %v732_v1 = vld [vmem:[#allocation2] sm:$0xff]   ;;  %v733_v2 = vld [vmem:[#allocation2 + $0x8] sm:$0xff]  }
  0x36   :  { %645 = vmatprep.subr.bf16.mxu0 %v844_v0  ;;  %661 = vmatprep.mubr.msk.bf16.mxu0 %vm845_vm0, %v844_v0  ;;  %v734_v3 = vld [vmem:[#allocation2 + $0x10] sm:$0xff]   ;;  %v741_v4 = vld [vmem:[#allocation4] sm:$0xff]   ;;  %v735_v5 = vld [vmem:[#allocation2 + $0x18] sm:$0xff]  }
  0x37   :  { %665 = vmatprep.subr.bf16.mxu1 %v844_v0  ;;  %681 = vmatprep.mubr.msk.bf16.mxu1 %vm845_vm0, %v844_v0  ;;  %v742_v6 = vld [vmem:[#allocation4 + $0x8] sm:$0xff]   ;;  %v736_v7 = vld [vmem:[#allocation2 + $0x20] sm:$0xff]   ;;  %v743_v8 = vld [vmem:[#allocation4 + $0x10] sm:$0xff]  }
  0x38   :  { %646 = vmatpush3.bf16.msra.mxu0 %v732_v1  ;;  %666 = vmatpush3.bf16.msra.mxu1 %v741_v4  ;;  %v737_v9 = vld [vmem:[#allocation2 + $0x28] sm:$0xff]   ;;  %v744_v10 = vld [vmem:[#allocation4 + $0x18] sm:$0xff]   ;;  %v738_v11 = vld [vmem:[#allocation2 + $0x30] sm:$0xff]  }
  0x39   :  { %647 = vmatprep.subr.bf16.mxu0 %v844_v0  ;;  %667 = vmatprep.subr.bf16.mxu1 %v844_v0  ;;  %v745_v12 = vld [vmem:[#allocation4 + $0x20] sm:$0xff]   ;;  %v739_v13 = vld [vmem:[#allocation2 + $0x38] sm:$0xff]   ;;  %v746_v14 = vld [vmem:[#allocation4 + $0x28] sm:$0xff]  }
  0x3a   :  { %v740_v15 = vld [vmem:[%s1030_s0] sm:$0xff]   ;;  %v747_v16 = vld [vmem:[#allocation4 + $0x30] sm:$0xff]   ;;  %v748_v17 = vld [vmem:[#allocation4 + $0x38] sm:$0xff]  }
  0x3b   :  { %v749_v18 = vld [vmem:[#allocation6] sm:$0xff]   ;;  %v750_v19 = vld [vmem:[#allocation6 + $0x8] sm:$0xff]   ;;  %v751_v20 = vld [vmem:[#allocation6 + $0x10] sm:$0xff]  }
  0x3c   :  { %648 = vmatpush3.bf16.msra.mxu0 %v733_v2  ;;  %668 = vmatpush3.bf16.msra.mxu1 %v742_v6  ;;  %v752_v21 = vld [vmem:[#allocation6 + $0x18] sm:$0xff]   ;;  %v753_v22 = vld [vmem:[#allocation6 + $0x20] sm:$0xff]   ;;  %v754_v23 = vld [vmem:[#allocation6 + $0x28] sm:$0xff]  }
  0x3d   :  { %649 = vmatprep.subr.bf16.mxu0 %v844_v0  ;;  %669 = vmatprep.subr.bf16.mxu1 %v844_v0  ;;  %v563_v24 = vld [vmem:[%s1032_s2] ss:$0 sm:$0xff]  ;;  %v755_v34 = vld [vmem:[#allocation6 + $0x30] sm:$0xff]   ;;  %v756_v35 = vld [vmem:[#allocation6 + $0x38] sm:$0xff]  }
  0x3e   :  { %v757_v36 = vld [vmem:[%s1037_s7] sm:$0xff]   ;;  %v758_v37 = vld [vmem:[%s1037_s7 + $0x8] sm:$0xff]   ;;  %v759_v38 = vld [vmem:[%s1037_s7 + $0x10] sm:$0xff]  }
  0x3f   :  { %v760_v39 = vld [vmem:[%s1037_s7 + $0x18] sm:$0xff]   ;;  %v761_v40 = vld [vmem:[%s1037_s7 + $0x20] sm:$0xff]   ;;  %v762_v41 = vld [vmem:[%s1037_s7 + $0x28] sm:$0xff]  }
  0x40   :  { %650 = vmatpush3.bf16.msra.mxu0 %v734_v3  ;;  %670 = vmatpush3.bf16.msra.mxu1 %v743_v8  ;;  %v573_v42 = vld [vmem:[%s1034_s4] ss:$0 sm:$0xff]  ;;  %v763_v52 = vld [vmem:[%s1037_s7 + $0x30] sm:$0xff]   ;;  %v764_v53 = vld [vmem:[%s1037_s7 + $0x38] sm:$0xff]  }
  0x41   :  { %651 = vmatprep.subr.bf16.mxu0 %v844_v0  ;;  %671 = vmatprep.subr.bf16.mxu1 %v844_v0  ;;  %v582_v54 = vld [vmem:[%s1036_s6] ss:$0 sm:$0xff] }
  0x44   :  { %652 = vmatpush3.bf16.msra.mxu0 %v735_v5  ;;  %672 = vmatpush3.bf16.msra.mxu1 %v744_v10 }
  0x45   :  { %653 = vmatprep.subr.bf16.mxu0 %v844_v0  ;;  %673 = vmatprep.subr.bf16.mxu1 %v844_v0 }
  0x48   :  { %654 = vmatpush3.bf16.msra.mxu0 %v736_v7  ;;  %674 = vmatpush3.bf16.msra.mxu1 %v745_v12 }
  0x49   :  { %655 = vmatprep.subr.bf16.mxu0 %v844_v0  ;;  %675 = vmatprep.subr.bf16.mxu1 %v844_v0 }
  0x4c   :  { %656 = vmatpush3.bf16.msra.mxu0 %v737_v9  ;;  %676 = vmatpush3.bf16.msra.mxu1 %v746_v14 }
  0x4d   :  { %657 = vmatprep.subr.bf16.mxu0 %v844_v0  ;;  %677 = vmatprep.subr.bf16.mxu1 %v844_v0 }
  0x50   :  { %658 = vmatpush3.bf16.msra.mxu0 %v738_v11  ;;  %678 = vmatpush3.bf16.msra.mxu1 %v747_v16 }
  0x51   :  { %659 = vmatprep.subr.bf16.mxu0 %v844_v0  ;;  %679 = vmatprep.subr.bf16.mxu1 %v844_v0 }
  0x54   :  { %660 = vmatpush3.bf16.msra.mxu0 %v739_v13  ;;  %680 = vmatpush3.bf16.msra.mxu1 %v748_v17 }
  0x55   :  { %685 = vmatprep.subr.bf16.mxu0 %v844_v0  ;;  %705 = vmatprep.subr.bf16.mxu1 %v844_v0 }
  0x57   :  { %662 = vmatmul.mubr.bf16.vlgmr.msra.gmra.mrb[0].mxu0 %v740_v15 }
  0x58   :  { %701 = vmatprep.mubr.msk.bf16.mxu0 %vm845_vm0, %v844_v0  ;;  %686 = vmatpush3.bf16.msra.mxu0 %v749_v18 }
  0x59   :  { %687 = vmatprep.subr.bf16.mxu0 %v844_v0 }
  0x5c   :  { %688 = vmatpush3.bf16.msra.mxu0 %v750_v19 }
  0x5d   :  { %689 = vmatprep.subr.bf16.mxu0 %v844_v0 }
  0x60   :  { %690 = vmatpush3.bf16.msra.mxu0 %v751_v20 }
  0x61   :  { %691 = vmatprep.subr.bf16.mxu0 %v844_v0 }
  0x64   :  { %692 = vmatpush3.bf16.msra.mxu0 %v752_v21 }
  0x65   :  { %693 = vmatprep.subr.bf16.mxu0 %v844_v0 }
  0x68   :  { %694 = vmatpush3.bf16.msra.mxu0 %v753_v22 }
  0x69   :  { %695 = vmatprep.subr.bf16.mxu0 %v844_v0 }
  0x6c   :  { %696 = vmatpush3.bf16.msra.mxu0 %v754_v23 }
  0x6d   :  { %697 = vmatprep.subr.bf16.mxu0 %v844_v0 }
  0x70   :  { %698 = vmatpush3.bf16.msra.mxu0 %v755_v34 }
  0x71   :  { %699 = vmatprep.subr.bf16.mxu0 %v844_v0 }
  0x74   :  { %700 = vmatpush3.bf16.msra.mxu0 %v756_v35 }
 0x12a   :  { %v187_v25 = vpop.f32.mrb[0].mxu0 }
 0x12b   :  { %v188_v26 = vadd.f32 %v563_v24, %v187_v25  ;;  %v663_v27 = vpop.f32.mrb[1].mxu0 }
 0x12c   :  { %v190_v28 = vpop.f32.mrb[2].mxu0 }
 0x12d   :  { %v191_v29 = vadd.f32 %v563_v24, %v190_v28  ;;  %v664_v30 = vpop.f32.mrb[3].mxu0  ;;  %v194_v31 = vmax.f32 %v188_v26, 0.0 }
 0x12f   :  { %v195_v32 = vmax.f32 %v191_v29, 0.0 }
 0x131   :  { %v196_v33 = vpack.c.bf16 %v195_v32, %v194_v31 }
 0x133   :  { %682 = vmatmul.mubr.bf16.vlgmr.msra.gmra.mrb[0].mxu1 %v196_v33 }
 0x134   :  { %721 = vmatprep.mubr.msk.bf16.mxu1 %vm845_vm0, %v844_v0  ;;  %706 = vmatpush3.bf16.msra.mxu1 %v757_v36 }
 0x135   :  { %707 = vmatprep.subr.bf16.mxu1 %v844_v0 }
 0x138   :  { %708 = vmatpush3.bf16.msra.mxu1 %v758_v37 }
 0x139   :  { %709 = vmatprep.subr.bf16.mxu1 %v844_v0 }
 0x13c   :  { %710 = vmatpush3.bf16.msra.mxu1 %v759_v38 }
 0x13d   :  { %711 = vmatprep.subr.bf16.mxu1 %v844_v0 }
 0x140   :  { %712 = vmatpush3.bf16.msra.mxu1 %v760_v39 }
 0x141   :  { %713 = vmatprep.subr.bf16.mxu1 %v844_v0 }
 0x144   :  { %714 = vmatpush3.bf16.msra.mxu1 %v761_v40 }
 0x145   :  { %715 = vmatprep.subr.bf16.mxu1 %v844_v0 }
 0x148   :  { %716 = vmatpush3.bf16.msra.mxu1 %v762_v41 }
 0x149   :  { %717 = vmatprep.subr.bf16.mxu1 %v844_v0 }
 0x14c   :  { %718 = vmatpush3.bf16.msra.mxu1 %v763_v52 }
 0x14d   :  { %719 = vmatprep.subr.bf16.mxu1 %v844_v0  ;;  %v591_v0 = vld [vmem:[%s1038_s8] ss:$0 sm:$0xff] }
 0x150   :  { %720 = vmatpush3.bf16.msra.mxu1 %v764_v53 }
 0x206   :  { %v302_v43 = vpop.f32.mrb[0].mxu1 }
 0x207   :  { %v303_v44 = vadd.f32 %v573_v42, %v302_v43  ;;  %v683_v45 = vpop.f32.mrb[1].mxu1 }
 0x208   :  { %v305_v46 = vpop.f32.mrb[2].mxu1 }
 0x209   :  { %v306_v47 = vadd.f32 %v573_v42, %v305_v46  ;;  %v684_v48 = vpop.f32.mrb[3].mxu1  ;;  %v309_v49 = vmax.f32 %v303_v44, 0.0 }
 0x20b   :  { %v310_v50 = vmax.f32 %v306_v47, 0.0 }
 0x20d   :  { %v311_v51 = vpack.c.bf16 %v310_v50, %v309_v49 }
 0x20f   :  { %702 = vmatmul.mubr.bf16.vlgmr.msra.gmra.mrb[4].mxu0 %v311_v51 }
 0x2e2   :  { %v417_v55 = vpop.f32.mrb[4].mxu0 }
 0x2e3   :  { %v418_v56 = vadd.f32 %v582_v54, %v417_v55  ;;  %v703_v57 = vpop.f32.mrb[5].mxu0 }
 0x2e4   :  { %v420_v58 = vpop.f32.mrb[6].mxu0 }
 0x2e5   :  { %v421_v59 = vadd.f32 %v582_v54, %v420_v58  ;;  %v704_v60 = vpop.f32.mrb[7].mxu0  ;;  %v424_v61 = vmax.f32 %v418_v56, 0.0 }
 0x2e7   :  { %v425_v62 = vmax.f32 %v421_v59, 0.0 }
 0x2e9   :  { %v426_v63 = vpack.c.bf16 %v425_v62, %v424_v61 }
 0x2eb   :  { %722 = vmatmul.mubr.bf16.vlgmr.msra.gmra.mrb[4].mxu1 %v426_v63 }
 0x3be   :  { %v532_v1 = vpop.f32.mrb[4].mxu1 }
 0x3bf   :  { %v533_v2 = vadd.f32 %v591_v0, %v532_v1  ;;  %v723_v3 = vpop.f32.mrb[5].mxu1 }
 0x3c0   :  { %v535_v4 = vpop.f32.mrb[6].mxu1 }
 0x3c1   :  { %v539_v5 = vmul.f32 0.5, %v533_v2  ;;  %v536_v6 = vadd.f32 %v591_v0, %v535_v4  ;;  %v724_v7 = vpop.f32.mrb[7].mxu1 }
 0x3c3   :  { %765 = vtanh.f32 %v539_v5  ;;  %v540_v8 = vmul.f32 0.5, %v536_v6 }
 0x3c5   :  { %767 = vtanh.f32 %v540_v8 }
 0x3cd   :  { %v766_v9 = vpop.eup %765 }
 0x3ce   :  { %v543_v10 = vadd.f32 1.0, %v766_v9 }
 0x3cf   :  { %v768_v11 = vpop.eup %767 }
 0x3d0   :  { %v544_v12 = vadd.f32 1.0, %v768_v11  ;;  %v545_v13 = vmul.f32 0.5, %v543_v10 }
 0x3d2   :  { %v546_v14 = vmul.f32 0.5, %v544_v12 }
 0x3d4   :  { %v607_v15 = vpack.c.bf16 %v546_v14, %v545_v13 }
 0x3d6   :  { %608 = vst [vmem:[%s1039_s9] sm:$0xff] %v607_v15  }
 0x3d7   :  { %561 = vsyncpa [#allocation3], 1 }
 0x3d8   :  { %562 = vsyncpa [#allocation5], 1 }

</bundles_post_ra>
